<compile_context>
chip_gen: v5e
topology: v5e:2x2
jax: 0.10.0
libtpu: 0.0.40
codegen_flags: <defaults>
</compile_context>

<pallas_src>
import numpy as np
import jax
import jax.numpy as jnp
from jax.experimental import pallas as pl
from jax.experimental.pallas import tpu as pltpu


def _side_output_kernel(x_ref, w_ref, b_ref, s_ref, r_ref, o_ref, convw_scr):
    # x_ref:      (1, C_in, H, W)      VMEM   (whole feature map of one image)
    # w_ref:      (C_out, C_in)        SMEM   (1x1 conv weights as scalars)
    # b_ref:      (C_out,)             SMEM
    # s_ref:      (W, img)             VMEM   one-hot column-upsample matrix
    # r_ref:      (TR, img? no -> H)   VMEM   one-hot row-upsample rows for this tile: (TR, H)
    # o_ref:      (1, C_out, TR, img)  VMEM   output tile (NCHW, lane-dense)
    # convw_scr:  (C_out, H, img)      VMEM   conv result, column-upsampled
    rt = pl.program_id(1)
    c_in = x_ref.shape[1]
    c_out = o_ref.shape[1]
    h, w = x_ref.shape[2], x_ref.shape[3]

    @pl.when(rt == 0)
    def _():
        # 1x1 conv at source resolution: VPU FMAs over input channels.
        # (in_channel is a small, static python int for this module, so a
        #  static loop is fine and keeps all indices static.)
        for o in range(c_out):
            acc = jnp.zeros((h, w), dtype=jnp.float32)
            for c in range(c_in):
                acc = acc + w_ref[o, c] * x_ref[0, c, :, :]
            acc = acc + b_ref[o]
            # Nearest upsample along W: one-hot matmul (H, W) @ (W, img).
            convw_scr[o] = jnp.dot(acc, s_ref[...],
                                   preferred_element_type=jnp.float32)

    # Nearest upsample along H for this tile of output rows:
    # (TR, H) one-hot @ (H, img) -> (TR, img), written straight into NCHW.
    for o in range(c_out):
        o_ref[0, o, :, :] = jnp.dot(
            r_ref[...], convw_scr[o],
            preferred_element_type=jnp.float32).astype(o_ref.dtype)


def _pick_row_tile(img):
    """Output-row tile size: multiple of 8, <= img, ~<=2 MiB output tile."""
    if img <= 8:
        return img
    cap = max(8, (((2 * 1024 * 1024) // (3 * 4 * img)) // 8) * 8)
    return max(8, min((img // 8) * 8, cap))


def side_output_forward(feature_nchw, weight, bias, img_size):
    """Mirrors side_output.forward.

    feature_nchw: (N, C_in, H, W) float32
    weight:       (C_out, C_in)  (PyTorch conv weight (3, C_in, 1, 1) squeezed)
    bias:         (C_out,)
    returns:      (N, C_out, img_size, img_size)  float32, NCHW
    """
    n, c_in, h, w = feature_nchw.shape
    c_out = weight.shape[0]
    img = int(img_size)

    tr = _pick_row_tile(img)
    n_row_tiles = pl.cdiv(img, tr)

    # One-hot selection matrices for PyTorch 'nearest' (floor(dst*in/out)).
    oh = np.minimum(np.arange(n_row_tiles * tr), img - 1)
    src_rows = (oh * h) // img
    r_mat = np.zeros((n_row_tiles * tr, h), np.float32)
    r_mat[np.arange(n_row_tiles * tr), src_rows] = 1.0

    ow = np.arange(img)
    src_cols = (ow * w) // img
    s_mat = np.zeros((w, img), np.float32)
    s_mat[src_cols, ow] = 1.0

    out = pl.pallas_call(
        _side_output_kernel,
        out_shape=jax.ShapeDtypeStruct((n, c_out, img, img), feature_nchw.dtype),
        grid_spec=pltpu.PrefetchScalarGridSpec(
            num_scalar_prefetch=0,
            grid=(n, n_row_tiles),
            in_specs=[
                # whole feature map of one image (DMA'd once per image)
                pl.BlockSpec((1, c_in, h, w), lambda ni, rt: (ni, 0, 0, 0)),
                # conv weights / bias as SMEM scalars
                pl.BlockSpec(memory_space=pltpu.MemorySpace.SMEM),
                pl.BlockSpec(memory_space=pltpu.MemorySpace.SMEM),
                # column-upsample one-hot (constant across the grid)
                pl.BlockSpec((w, img), lambda ni, rt: (0, 0)),
                # row-upsample one-hot rows for this output-row tile
                pl.BlockSpec((tr, h), lambda ni, rt: (rt, 0)),
            ],
            out_specs=pl.BlockSpec((1, c_out, tr, img),
                                   lambda ni, rt: (ni, 0, rt, 0)),
            scratch_shapes=[pltpu.VMEM((c_out, h, img), jnp.float32)],
        ),
        compiler_params=pltpu.CompilerParams(
            dimension_semantics=("parallel", "arbitrary")),
    )(feature_nchw, weight, bias, jnp.asarray(s_mat), jnp.asarray(r_mat))
    return out


if __name__ == "__main__":
    key = jax.random.PRNGKey(0)
    k_x, k_w, k_b = jax.random.split(key, 3)

    # small shapes: batch=2, in_channel=4, feature spatial 8x8, img_size=16
    N, C_in, H, W = 2, 4, 8, 8
    img_size = 16

    x = jax.random.normal(k_x, (N, C_in, H, W), dtype=jnp.float32)
    # PyTorch Conv2d(in_channel, 3, 1): weight (3, C_in, 1, 1), bias (3,)
    w_torch_layout = jax.random.normal(k_w, (3, C_in, 1, 1), dtype=jnp.float32) * 0.1
    bias = jax.random.normal(k_b, (3,), dtype=jnp.float32) * 0.1
    weight = w_torch_layout[:, :, 0, 0]               # (3, C_in)

    out = side_output_forward(x, weight, bias, img_size)
    out = jax.block_until_ready(out)

    assert out.shape == (N, 3, img_size, img_size), out.shape

    # sanity: compare against a plain-JAX reference of the same math
    ref_conv = jnp.einsum("nchw,oc->nohw", x, weight) + bias[None, :, None, None]
    rows = (jnp.arange(img_size) * H) // img_size
    cols = (jnp.arange(img_size) * W) // img_size
    ref = ref_conv[:, :, rows][:, :, :, cols]
    assert jnp.allclose(out, ref, atol=1e-5, rtol=1e-5)

    print("KERNEL_OK")
</pallas_src>

<mosaic_0001>
module attributes {stable_mosaic.version = 11 : i64} {
  func.func @_side_output_kernel(%arg0: i32, %arg1: i32, %arg2: memref<1x4x8x8xf32, #tpu.memory_space<vmem>>, %arg3: memref<3x4xf32, #tpu.memory_space<smem>>, %arg4: memref<3xf32, #tpu.memory_space<smem>>, %arg5: memref<8x16xf32, #tpu.memory_space<vmem>>, %arg6: memref<16x8xf32, #tpu.memory_space<vmem>>, %arg7: memref<1x3x16x16xf32, #tpu.memory_space<vmem>>, %arg8: memref<3x8x16xf32, #tpu.memory_space<vmem>>) attributes {dimension_semantics = [#tpu.dimension_semantics<parallel>, #tpu.dimension_semantics<arbitrary>], iteration_bounds = array<i64: 2, 1>, scalar_prefetch = 0 : i64, scratch_operands = 1 : i64, tpu.core_type = #tpu.core_type<tc>, window_params = [{transform_indices = @transform_0, window_bounds = array<i64: 1, 4, 8, 8>}, {transform_indices = @transform_1, window_bounds = array<i64: 3, 4>}, {transform_indices = @transform_2, window_bounds = array<i64: 3>}, {pipeline_mode = #tpu.pipeline_mode<synchronous>, transform_indices = @transform_3, window_bounds = array<i64: 8, 16>}, {transform_indices = @transform_4, window_bounds = array<i64: 16, 8>}, {transform_indices = @transform_5, window_bounds = array<i64: 1, 3, 16, 16>}]} {
    %c0_i32 = arith.constant 0 : i32
    %0 = arith.cmpi eq, %arg1, %c0_i32 : i32
    %1 = arith.extui %0 : i1 to i32
    %c0_i32_0 = arith.constant 0 : i32
    %2 = arith.cmpi ne, %1, %c0_i32_0 : i32
    scf.if %2 {
      %cst_27 = arith.constant 0.000000e+00 : f32
      %24 = vector.broadcast %cst_27 : f32 to vector<8x8xf32>
      %c0_28 = arith.constant 0 : index
      %c0_29 = arith.constant 0 : index
      %25 = memref.load %arg3[%c0_28, %c0_29] : memref<3x4xf32, #tpu.memory_space<smem>>
      %c0_30 = arith.constant 0 : index
      %c0_31 = arith.constant 0 : index
      %c0_32 = arith.constant 0 : index
      %c0_33 = arith.constant 0 : index
      %26 = vector.load %arg2[%c0_30, %c0_31, %c0_32, %c0_33] : memref<1x4x8x8xf32, #tpu.memory_space<vmem>>, vector<1x1x8x8xf32>
      %27 = vector.shape_cast %26 : vector<1x1x8x8xf32> to vector<8x8xf32>
      %28 = vector.broadcast %25 : f32 to vector<8x8xf32>
      %29 = arith.mulf %28, %27 : vector<8x8xf32>
      %30 = arith.addf %24, %29 : vector<8x8xf32>
      %c0_34 = arith.constant 0 : index
      %c1_35 = arith.constant 1 : index
      %31 = memref.load %arg3[%c0_34, %c1_35] : memref<3x4xf32, #tpu.memory_space<smem>>
      %c0_36 = arith.constant 0 : index
      %c1_37 = arith.constant 1 : index
      %c0_38 = arith.constant 0 : index
      %c0_39 = arith.constant 0 : index
      %32 = vector.load %arg2[%c0_36, %c1_37, %c0_38, %c0_39] : memref<1x4x8x8xf32, #tpu.memory_space<vmem>>, vector<1x1x8x8xf32>
      %33 = vector.shape_cast %32 : vector<1x1x8x8xf32> to vector<8x8xf32>
      %34 = vector.broadcast %31 : f32 to vector<8x8xf32>
      %35 = arith.mulf %34, %33 : vector<8x8xf32>
      %36 = arith.addf %30, %35 : vector<8x8xf32>
      %c0_40 = arith.constant 0 : index
      %c2_41 = arith.constant 2 : index
      %37 = memref.load %arg3[%c0_40, %c2_41] : memref<3x4xf32, #tpu.memory_space<smem>>
      %c0_42 = arith.constant 0 : index
      %c2_43 = arith.constant 2 : index
      %c0_44 = arith.constant 0 : index
      %c0_45 = arith.constant 0 : index
      %38 = vector.load %arg2[%c0_42, %c2_43, %c0_44, %c0_45] : memref<1x4x8x8xf32, #tpu.memory_space<vmem>>, vector<1x1x8x8xf32>
      %39 = vector.shape_cast %38 : vector<1x1x8x8xf32> to vector<8x8xf32>
      %40 = vector.broadcast %37 : f32 to vector<8x8xf32>
      %41 = arith.mulf %40, %39 : vector<8x8xf32>
      %42 = arith.addf %36, %41 : vector<8x8xf32>
      %c0_46 = arith.constant 0 : index
      %c3 = arith.constant 3 : index
      %43 = memref.load %arg3[%c0_46, %c3] : memref<3x4xf32, #tpu.memory_space<smem>>
      %c0_47 = arith.constant 0 : index
      %c3_48 = arith.constant 3 : index
      %c0_49 = arith.constant 0 : index
      %c0_50 = arith.constant 0 : index
      %44 = vector.load %arg2[%c0_47, %c3_48, %c0_49, %c0_50] : memref<1x4x8x8xf32, #tpu.memory_space<vmem>>, vector<1x1x8x8xf32>
      %45 = vector.shape_cast %44 : vector<1x1x8x8xf32> to vector<8x8xf32>
      %46 = vector.broadcast %43 : f32 to vector<8x8xf32>
      %47 = arith.mulf %46, %45 : vector<8x8xf32>
      %48 = arith.addf %42, %47 : vector<8x8xf32>
      %c0_51 = arith.constant 0 : index
      %49 = memref.load %arg4[%c0_51] : memref<3xf32, #tpu.memory_space<smem>>
      %50 = vector.broadcast %49 : f32 to vector<8x8xf32>
      %51 = arith.addf %48, %50 : vector<8x8xf32>
      %c0_52 = arith.constant 0 : index
      %c0_53 = arith.constant 0 : index
      %52 = vector.load %arg5[%c0_52, %c0_53] : memref<8x16xf32, #tpu.memory_space<vmem>>, vector<8x16xf32>
      %cst_54 = arith.constant dense<0.000000e+00> : vector<8x16xf32>
      %53 = tpu.matmul %51, %52, %cst_54 {dimension_numbers = #tpu.dot_dimension_numbers<[1], [0], [0], [1], [0, 0, 1, 1], [], []>} : vector<8x8xf32>, vector<8x16xf32>, vector<8x16xf32> -> vector<8x16xf32>
      %c0_55 = arith.constant 0 : index
      %c0_56 = arith.constant 0 : index
      %c0_57 = arith.constant 0 : index
      %54 = vector.load %arg8[%c0_55, %c0_56, %c0_57] : memref<3x8x16xf32, #tpu.memory_space<vmem>>, vector<1x8x16xf32>
      %55 = vector.shape_cast %54 : vector<1x8x16xf32> to vector<8x16xf32>
      %56 = vector.shape_cast %53 : vector<8x16xf32> to vector<1x8x16xf32>
      tpu.vector_store %arg8[%c0_55, %c0_56, %c0_57], %56 {strides = array<i32>} : memref<3x8x16xf32, #tpu.memory_space<vmem>>, vector<1x8x16xf32>,
      %cst_58 = arith.constant 0.000000e+00 : f32
      %57 = vector.broadcast %cst_58 : f32 to vector<8x8xf32>
      %c1_59 = arith.constant 1 : index
      %c0_60 = arith.constant 0 : index
      %58 = memref.load %arg3[%c1_59, %c0_60] : memref<3x4xf32, #tpu.memory_space<smem>>
      %c0_61 = arith.constant 0 : index
      %c0_62 = arith.constant 0 : index
      %c0_63 = arith.constant 0 : index
      %c0_64 = arith.constant 0 : index
      %59 = vector.load %arg2[%c0_61, %c0_62, %c0_63, %c0_64] : memref<1x4x8x8xf32, #tpu.memory_space<vmem>>, vector<1x1x8x8xf32>
      %60 = vector.shape_cast %59 : vector<1x1x8x8xf32> to vector<8x8xf32>
      %61 = vector.broadcast %58 : f32 to vector<8x8xf32>
      %62 = arith.mulf %61, %60 : vector<8x8xf32>
      %63 = arith.addf %57, %62 : vector<8x8xf32>
      %c1_65 = arith.constant 1 : index
      %c1_66 = arith.constant 1 : index
      %64 = memref.load %arg3[%c1_65, %c1_66] : memref<3x4xf32, #tpu.memory_space<smem>>
      %c0_67 = arith.constant 0 : index
      %c1_68 = arith.constant 1 : index
      %c0_69 = arith.constant 0 : index
      %c0_70 = arith.constant 0 : index
      %65 = vector.load %arg2[%c0_67, %c1_68, %c0_69, %c0_70] : memref<1x4x8x8xf32, #tpu.memory_space<vmem>>, vector<1x1x8x8xf32>
      %66 = vector.shape_cast %65 : vector<1x1x8x8xf32> to vector<8x8xf32>
      %67 = vector.broadcast %64 : f32 to vector<8x8xf32>
      %68 = arith.mulf %67, %66 : vector<8x8xf32>
      %69 = arith.addf %63, %68 : vector<8x8xf32>
      %c1_71 = arith.constant 1 : index
      %c2_72 = arith.constant 2 : index
      %70 = memref.load %arg3[%c1_71, %c2_72] : memref<3x4xf32, #tpu.memory_space<smem>>
      %c0_73 = arith.constant 0 : index
      %c2_74 = arith.constant 2 : index
      %c0_75 = arith.constant 0 : index
      %c0_76 = arith.constant 0 : index
      %71 = vector.load %arg2[%c0_73, %c2_74, %c0_75, %c0_76] : memref<1x4x8x8xf32, #tpu.memory_space<vmem>>, vector<1x1x8x8xf32>
      %72 = vector.shape_cast %71 : vector<1x1x8x8xf32> to vector<8x8xf32>
      %73 = vector.broadcast %70 : f32 to vector<8x8xf32>
      %74 = arith.mulf %73, %72 : vector<8x8xf32>
      %75 = arith.addf %69, %74 : vector<8x8xf32>
      %c1_77 = arith.constant 1 : index
      %c3_78 = arith.constant 3 : index
      %76 = memref.load %arg3[%c1_77, %c3_78] : memref<3x4xf32, #tpu.memory_space<smem>>
      %c0_79 = arith.constant 0 : index
      %c3_80 = arith.constant 3 : index
      %c0_81 = arith.constant 0 : index
      %c0_82 = arith.constant 0 : index
      %77 = vector.load %arg2[%c0_79, %c3_80, %c0_81, %c0_82] : memref<1x4x8x8xf32, #tpu.memory_space<vmem>>, vector<1x1x8x8xf32>
      %78 = vector.shape_cast %77 : vector<1x1x8x8xf32> to vector<8x8xf32>
      %79 = vector.broadcast %76 : f32 to vector<8x8xf32>
      %80 = arith.mulf %79, %78 : vector<8x8xf32>
      %81 = arith.addf %75, %80 : vector<8x8xf32>
      %c1_83 = arith.constant 1 : index
      %82 = memref.load %arg4[%c1_83] : memref<3xf32, #tpu.memory_space<smem>>
      %83 = vector.broadcast %82 : f32 to vector<8x8xf32>
      %84 = arith.addf %81, %83 : vector<8x8xf32>
      %c0_84 = arith.constant 0 : index
      %c0_85 = arith.constant 0 : index
      %85 = vector.load %arg5[%c0_84, %c0_85] : memref<8x16xf32, #tpu.memory_space<vmem>>, vector<8x16xf32>
      %cst_86 = arith.constant dense<0.000000e+00> : vector<8x16xf32>
      %86 = tpu.matmul %84, %85, %cst_86 {dimension_numbers = #tpu.dot_dimension_numbers<[1], [0], [0], [1], [0, 0, 1, 1], [], []>} : vector<8x8xf32>, vector<8x16xf32>, vector<8x16xf32> -> vector<8x16xf32>
      %c1_87 = arith.constant 1 : index
      %c0_88 = arith.constant 0 : index
      %c0_89 = arith.constant 0 : index
      %87 = vector.load %arg8[%c1_87, %c0_88, %c0_89] : memref<3x8x16xf32, #tpu.memory_space<vmem>>, vector<1x8x16xf32>
      %88 = vector.shape_cast %87 : vector<1x8x16xf32> to vector<8x16xf32>
      %89 = vector.shape_cast %86 : vector<8x16xf32> to vector<1x8x16xf32>
      tpu.vector_store %arg8[%c1_87, %c0_88, %c0_89], %89 {strides = array<i32>} : memref<3x8x16xf32, #tpu.memory_space<vmem>>, vector<1x8x16xf32>,
      %cst_90 = arith.constant 0.000000e+00 : f32
      %90 = vector.broadcast %cst_90 : f32 to vector<8x8xf32>
      %c2_91 = arith.constant 2 : index
      %c0_92 = arith.constant 0 : index
      %91 = memref.load %arg3[%c2_91, %c0_92] : memref<3x4xf32, #tpu.memory_space<smem>>
      %c0_93 = arith.constant 0 : index
      %c0_94 = arith.constant 0 : index
      %c0_95 = arith.constant 0 : index
      %c0_96 = arith.constant 0 : index
      %92 = vector.load %arg2[%c0_93, %c0_94, %c0_95, %c0_96] : memref<1x4x8x8xf32, #tpu.memory_space<vmem>>, vector<1x1x8x8xf32>
      %93 = vector.shape_cast %92 : vector<1x1x8x8xf32> to vector<8x8xf32>
      %94 = vector.broadcast %91 : f32 to vector<8x8xf32>
      %95 = arith.mulf %94, %93 : vector<8x8xf32>
      %96 = arith.addf %90, %95 : vector<8x8xf32>
      %c2_97 = arith.constant 2 : index
      %c1_98 = arith.constant 1 : index
      %97 = memref.load %arg3[%c2_97, %c1_98] : memref<3x4xf32, #tpu.memory_space<smem>>
      %c0_99 = arith.constant 0 : index
      %c1_100 = arith.constant 1 : index
      %c0_101 = arith.constant 0 : index
      %c0_102 = arith.constant 0 : index
      %98 = vector.load %arg2[%c0_99, %c1_100, %c0_101, %c0_102] : memref<1x4x8x8xf32, #tpu.memory_space<vmem>>, vector<1x1x8x8xf32>
      %99 = vector.shape_cast %98 : vector<1x1x8x8xf32> to vector<8x8xf32>
      %100 = vector.broadcast %97 : f32 to vector<8x8xf32>
      %101 = arith.mulf %100, %99 : vector<8x8xf32>
      %102 = arith.addf %96, %101 : vector<8x8xf32>
      %c2_103 = arith.constant 2 : index
      %c2_104 = arith.constant 2 : index
      %103 = memref.load %arg3[%c2_103, %c2_104] : memref<3x4xf32, #tpu.memory_space<smem>>
      %c0_105 = arith.constant 0 : index
      %c2_106 = arith.constant 2 : index
      %c0_107 = arith.constant 0 : index
      %c0_108 = arith.constant 0 : index
      %104 = vector.load %arg2[%c0_105, %c2_106, %c0_107, %c0_108] : memref<1x4x8x8xf32, #tpu.memory_space<vmem>>, vector<1x1x8x8xf32>
      %105 = vector.shape_cast %104 : vector<1x1x8x8xf32> to vector<8x8xf32>
      %106 = vector.broadcast %103 : f32 to vector<8x8xf32>
      %107 = arith.mulf %106, %105 : vector<8x8xf32>
      %108 = arith.addf %102, %107 : vector<8x8xf32>
      %c2_109 = arith.constant 2 : index
      %c3_110 = arith.constant 3 : index
      %109 = memref.load %arg3[%c2_109, %c3_110] : memref<3x4xf32, #tpu.memory_space<smem>>
      %c0_111 = arith.constant 0 : index
      %c3_112 = arith.constant 3 : index
      %c0_113 = arith.constant 0 : index
      %c0_114 = arith.constant 0 : index
      %110 = vector.load %arg2[%c0_111, %c3_112, %c0_113, %c0_114] : memref<1x4x8x8xf32, #tpu.memory_space<vmem>>, vector<1x1x8x8xf32>
      %111 = vector.shape_cast %110 : vector<1x1x8x8xf32> to vector<8x8xf32>
      %112 = vector.broadcast %109 : f32 to vector<8x8xf32>
      %113 = arith.mulf %112, %111 : vector<8x8xf32>
      %114 = arith.addf %108, %113 : vector<8x8xf32>
      %c2_115 = arith.constant 2 : index
      %115 = memref.load %arg4[%c2_115] : memref<3xf32, #tpu.memory_space<smem>>
      %116 = vector.broadcast %115 : f32 to vector<8x8xf32>
      %117 = arith.addf %114, %116 : vector<8x8xf32>
      %c0_116 = arith.constant 0 : index
      %c0_117 = arith.constant 0 : index
      %118 = vector.load %arg5[%c0_116, %c0_117] : memref<8x16xf32, #tpu.memory_space<vmem>>, vector<8x16xf32>
      %cst_118 = arith.constant dense<0.000000e+00> : vector<8x16xf32>
      %119 = tpu.matmul %117, %118, %cst_118 {dimension_numbers = #tpu.dot_dimension_numbers<[1], [0], [0], [1], [0, 0, 1, 1], [], []>} : vector<8x8xf32>, vector<8x16xf32>, vector<8x16xf32> -> vector<8x16xf32>
      %c2_119 = arith.constant 2 : index
      %c0_120 = arith.constant 0 : index
      %c0_121 = arith.constant 0 : index
      %120 = vector.load %arg8[%c2_119, %c0_120, %c0_121] : memref<3x8x16xf32, #tpu.memory_space<vmem>>, vector<1x8x16xf32>
      %121 = vector.shape_cast %120 : vector<1x8x16xf32> to vector<8x16xf32>
      %122 = vector.shape_cast %119 : vector<8x16xf32> to vector<1x8x16xf32>
      tpu.vector_store %arg8[%c2_119, %c0_120, %c0_121], %122 {strides = array<i32>} : memref<3x8x16xf32, #tpu.memory_space<vmem>>, vector<1x8x16xf32>,
    } else {
    }
    %c0 = arith.constant 0 : index
    %c0_1 = arith.constant 0 : index
    %3 = vector.load %arg6[%c0, %c0_1] : memref<16x8xf32, #tpu.memory_space<vmem>>, vector<16x8xf32>
    %c0_2 = arith.constant 0 : index
    %c0_3 = arith.constant 0 : index
    %c0_4 = arith.constant 0 : index
    %4 = vector.load %arg8[%c0_2, %c0_3, %c0_4] : memref<3x8x16xf32, #tpu.memory_space<vmem>>, vector<1x8x16xf32>
    %5 = vector.shape_cast %4 : vector<1x8x16xf32> to vector<8x16xf32>
    %cst = arith.constant dense<0.000000e+00> : vector<16x16xf32>
    %6 = tpu.matmul %3, %5, %cst {dimension_numbers = #tpu.dot_dimension_numbers<[1], [0], [0], [1], [0, 0, 1, 1], [], []>} : vector<16x8xf32>, vector<8x16xf32>, vector<16x16xf32> -> vector<16x16xf32>
    %c0_5 = arith.constant 0 : index
    %c0_6 = arith.constant 0 : index
    %c0_7 = arith.constant 0 : index
    %c0_8 = arith.constant 0 : index
    %7 = vector.load %arg7[%c0_5, %c0_6, %c0_7, %c0_8] : memref<1x3x16x16xf32, #tpu.memory_space<vmem>>, vector<1x1x16x16xf32>
    %8 = vector.shape_cast %7 : vector<1x1x16x16xf32> to vector<16x16xf32>
    %9 = vector.shape_cast %6 : vector<16x16xf32> to vector<1x1x16x16xf32>
    tpu.vector_store %arg7[%c0_5, %c0_6, %c0_7, %c0_8], %9 {strides = array<i32>} : memref<1x3x16x16xf32, #tpu.memory_space<vmem>>, vector<1x1x16x16xf32>,
    %c0_9 = arith.constant 0 : index
    %c0_10 = arith.constant 0 : index
    %10 = vector.load %arg6[%c0_9, %c0_10] : memref<16x8xf32, #tpu.memory_space<vmem>>, vector<16x8xf32>
    %c1 = arith.constant 1 : index
    %c0_11 = arith.constant 0 : index
    %c0_12 = arith.constant 0 : index
    %11 = vector.load %arg8[%c1, %c0_11, %c0_12] : memref<3x8x16xf32, #tpu.memory_space<vmem>>, vector<1x8x16xf32>
    %12 = vector.shape_cast %11 : vector<1x8x16xf32> to vector<8x16xf32>
    %cst_13 = arith.constant dense<0.000000e+00> : vector<16x16xf32>
    %13 = tpu.matmul %10, %12, %cst_13 {dimension_numbers = #tpu.dot_dimension_numbers<[1], [0], [0], [1], [0, 0, 1, 1], [], []>} : vector<16x8xf32>, vector<8x16xf32>, vector<16x16xf32> -> vector<16x16xf32>
    %c0_14 = arith.constant 0 : index
    %c1_15 = arith.constant 1 : index
    %c0_16 = arith.constant 0 : index
    %c0_17 = arith.constant 0 : index
    %14 = vector.load %arg7[%c0_14, %c1_15, %c0_16, %c0_17] : memref<1x3x16x16xf32, #tpu.memory_space<vmem>>, vector<1x1x16x16xf32>
    %15 = vector.shape_cast %14 : vector<1x1x16x16xf32> to vector<16x16xf32>
    %16 = vector.shape_cast %13 : vector<16x16xf32> to vector<1x1x16x16xf32>
    tpu.vector_store %arg7[%c0_14, %c1_15, %c0_16, %c0_17], %16 {strides = array<i32>} : memref<1x3x16x16xf32, #tpu.memory_space<vmem>>, vector<1x1x16x16xf32>,
    %c0_18 = arith.constant 0 : index
    %c0_19 = arith.constant 0 : index
    %17 = vector.load %arg6[%c0_18, %c0_19] : memref<16x8xf32, #tpu.memory_space<vmem>>, vector<16x8xf32>
    %c2 = arith.constant 2 : index
    %c0_20 = arith.constant 0 : index
    %c0_21 = arith.constant 0 : index
    %18 = vector.load %arg8[%c2, %c0_20, %c0_21] : memref<3x8x16xf32, #tpu.memory_space<vmem>>, vector<1x8x16xf32>
    %19 = vector.shape_cast %18 : vector<1x8x16xf32> to vector<8x16xf32>
    %cst_22 = arith.constant dense<0.000000e+00> : vector<16x16xf32>
    %20 = tpu.matmul %17, %19, %cst_22 {dimension_numbers = #tpu.dot_dimension_numbers<[1], [0], [0], [1], [0, 0, 1, 1], [], []>} : vector<16x8xf32>, vector<8x16xf32>, vector<16x16xf32> -> vector<16x16xf32>
    %c0_23 = arith.constant 0 : index
    %c2_24 = arith.constant 2 : index
    %c0_25 = arith.constant 0 : index
    %c0_26 = arith.constant 0 : index
    %21 = vector.load %arg7[%c0_23, %c2_24, %c0_25, %c0_26] : memref<1x3x16x16xf32, #tpu.memory_space<vmem>>, vector<1x1x16x16xf32>
    %22 = vector.shape_cast %21 : vector<1x1x16x16xf32> to vector<16x16xf32>
    %23 = vector.shape_cast %20 : vector<16x16xf32> to vector<1x1x16x16xf32>
    tpu.vector_store %arg7[%c0_23, %c2_24, %c0_25, %c0_26], %23 {strides = array<i32>} : memref<1x3x16x16xf32, #tpu.memory_space<vmem>>, vector<1x1x16x16xf32>,
    return
  }
  func.func @transform_0(%arg0: i32, %arg1: i32) -> (i32, i32, i32, i32) {
    %c0_i32 = arith.constant 0 : i32
    %c0_i32_0 = arith.constant 0 : i32
    %c0_i32_1 = arith.constant 0 : i32
    %c0_i32_2 = arith.constant 0 : i32
    return %arg0, %c0_i32, %c0_i32_0, %c0_i32_1 : i32, i32, i32, i32
  }
  func.func @transform_1(%arg0: i32, %arg1: i32) -> (i32, i32) {
    %c0_i32 = arith.constant 0 : i32
    %c0_i32_0 = arith.constant 0 : i32
    %c0_i32_1 = arith.constant 0 : i32
    return %c0_i32, %c0_i32_0 : i32, i32
  }
  func.func @transform_2(%arg0: i32, %arg1: i32) -> i32 {
    %c0_i32 = arith.constant 0 : i32
    %c0_i32_0 = arith.constant 0 : i32
    return %c0_i32 : i32
  }
  func.func @transform_3(%arg0: i32, %arg1: i32) -> (i32, i32) {
    %c0_i32 = arith.constant 0 : i32
    %c0_i32_0 = arith.constant 0 : i32
    %c0_i32_1 = arith.constant 0 : i32
    return %c0_i32, %c0_i32_0 : i32, i32
  }
  func.func @transform_4(%arg0: i32, %arg1: i32) -> (i32, i32) {
    %c0_i32 = arith.constant 0 : i32
    %c0_i32_0 = arith.constant 0 : i32
    return %arg1, %c0_i32 : i32, i32
  }
  func.func @transform_5(%arg0: i32, %arg1: i32) -> (i32, i32, i32, i32) {
    %c0_i32 = arith.constant 0 : i32
    %c0_i32_0 = arith.constant 0 : i32
    %c0_i32_1 = arith.constant 0 : i32
    return %arg0, %c0_i32, %arg1, %c0_i32_0 : i32, i32, i32, i32
  }
}

</mosaic_0001>

<bundles_post_ra>
// kernel: tpu_custom_call.1
= control target key start
LH: loop header
LB: loop body
LE: loop exit
PB: predicated region body
PF: predicated region fallthrough
CT: control target
= control target key end

     0   :  { %s1233_s0 = inlined_call_operand.hbm [shape: f32[2,4,8,8], index: 0, kind: input, shape index: {}]   ;;  %s1234_s1 = inlined_call_operand.vmem [shape: f32[3,4], index: 1, kind: input, shape index: {}]   ;;  %s1235_s2 = inlined_call_operand.vmem [shape: f32[3], index: 2, kind: input, shape index: {}]   ;;  %s1236_s3 = inlined_call_operand.vmem [shape: f32[8,16], index: 3, kind: input, shape index: {}]   ;;  %s1237_s4 = inlined_call_operand.vmem [shape: f32[16,8], index: 4, kind: input, shape index: {}]   ;;  %s1238_s5 = inlined_call_operand.hbm [shape: f32[2,3,16,16], index: 5, kind: output, shape index: {}]  }
   0x1   :  { %1241 = sst [smem:[#allocation16_spill]] %s1234_s1 }
   0x2   :  { %1242 = sst [smem:[#allocation17_spill]] %s1235_s2 }
   0x3   :  { %10 = vsyncpa [#allocation4], 0 }
   0x4   :  { %12 = vsyncpa [#allocation4 + $0x1], 0 }
   0x5   :  { %13 = vsyncpa [#allocation6], 0 }
   0x6   :  { %14 = vsyncpa [#allocation9], 0 }
   0x7   :  { %15 = vsyncpa [#allocation5], 0 }
   0x8   :  { %17 = vsyncpa [#allocation5 + $0x1], 0  ;;  %s1041_s18 = smov 0   ;;  %s1043_s19 = smov 0  }
   0x9   :  { %s1045_s20 = smov 0   ;;  %s1047_s21 = smov 0  }
   0xa   :  { %s1049_s22 = smov 0   ;;  %s1051_s23 = smov 0  }
   0xb LB: > { %1243 = sst [smem:[#allocation15_spill]] %s1003_s23  ;;  %s711_s24 = sadd.s32 4294967295, %s1003_s23   ;;  %s1003_s23 = sphi %s1051_s23, %s23_s23   ;;  %s999_s22 = sphi %s1049_s22, %s1259_s22   ;;  %s995_s21 = sphi %s1047_s21, %s1258_s21   ;;  %s991_s20 = sphi %s1045_s20, %s1257_s20   ;;  %s987_s19 = sphi %s1043_s19, %s1256_s19   ;;  %s983_s18 = sphi %s1041_s18, %s1255_s18  }
   0xc   : > { %s712_s25 = sadd.s32 4294967294, %s1003_s23   ;;  %p49_p0 = scmp.ne.s32.totalorder %s991_s20, %s987_s19 }
   0xd   : > { %p50_p1 = scmp.eq.s32.totalorder %s1003_s23, 0  ;;  %p55_p2 = scmp.ne.s32.totalorder %s987_s19, %s983_s18 }
   0xe   : > { %p1079_p3 = scmp.eq.s32.totalorder %s711_s24, 0  ;;  %p170_p4 = scmp.eq.s32.totalorder %s711_s24, 1 }
   0xf   : > { %p1083_p5 = por %p50_p1, %p49_p0  ;;  %p176_p6 = scmp.eq.s32.totalorder %s712_s25, 1 }
  0x10   : > { %p1089_p7 = por %p1079_p3, %p55_p2  ;;  %p1093_p8 = por %p170_p4, %p49_p0 }
  0x11   : > { %p1097_p9 = por %p176_p6, %p55_p2  ;;  %p713_p10 = scmp.ge.s32.totalorder %s1003_s23, 1 }
  0x12   : > { %p183_p11 = scmp.lt.s32.totalorder %s1003_s23, 3  ;;  %s1249_s1 = sld [smem:[#allocation16_spill]] }
  0x13   : > { %p717_p13 = scmp.ge.s32.totalorder %s1003_s23, 2  ;;  %p795_p0 = scmp.lt.s32.totalorder %s1003_s23, 2 }
  0x14   : > { %p1106_p12 = pnand %p713_p10, %p183_p11  ;;  %s1251_s2 = sld [smem:[#allocation17_spill]] }
  0x15   : > { %p1119_p2 = pnand %p795_p0, %p1083_p5  ;;  %s1005_s15 = smov [#allocation7]  }
  0x16   : > { %p778_p1 = pneg %p1106_p12  ;;  %s1006_s16 = smov [#allocation8]  }
  0x17   : > { %s35_s17 = sadd.s32 1, %s999_s22  ;;  %s228_s24 = sand.u32 1, %s991_s20  }
  0x18   : > { %s195_s9 = sshll.u32 %s1249_s1, 4  ;;  %p779_p4 = pnand %p778_p1, %p1079_p3  ;;  %s196_s9 = int_to_ptr.vmem [resolvable:$true] %s195_s9 }
  0x19   : > { %p37_p6 = scmp.ge.s32.totalorder %s35_s17, 2  ;;  %s718_s25 = sshll.u32 %s228_s24, 5 }
  0x1a   : > { %s205_s13 = sshll.u32 %s1251_s2, 4  ;;  %s763_s7 = sshll.u32 %s999_s22, 5  ;;  %s206_s13 = int_to_ptr.vmem [resolvable:$true] %s205_s13 }
  0x1b   : > { %781 = dma.vmem_to_smem (!%p779_p4), %s196_s9, 64, %s1005_s15, [#allocation6]  }
  0x1c   : > { %784 = dma.vmem_to_smem (!%p779_p4), %s206_s13, 16, %s1006_s16, [#allocation9]  }
  0x1d   : > { %s1261_s17 = smov (%p37_p6, %s35_s17), 0  ;;  %s237_s11 = scalar_lea.hbm %s1233_s0, %s763_s7 }
  0x1e   : > { %s39_s12 = ssub.s32 %s999_s22, %s1261_s17  ;;  %s238_s26 = sshll.u32 %s237_s11, 4  ;;  %s239_s26 = int_to_ptr.hbm [resolvable:$true] %s238_s26 }
  0x1f   : > { %p40_p5 = scmp.eq.s32.totalorder %s39_s12, 0  ;;  %s232_s9 = scalar_lea.vmem [#allocation3], %s718_s25 }
  0x20   : > { %s240_s15 = sshll.u32 %s232_s9, 4  ;;  %s1253_s13 = sadd.s32 1, %s991_s20  ;;  %s241_s15 = int_to_ptr.vmem [resolvable:$true] %s240_s15 }
  0x21   : > { %s1138_s16 = scalar_select %p40_p5, %s991_s20, %s1253_s13  }
  0x22   : > { %s229_s1 = scalar_lea.sflag [#allocation4], %s228_s24  ;;  %s1007_s2 = smov 128  }
  0x23   : > { %s1008_s23 = smov 8   ;;  %252 = sbr.rel (%p1106_p12) target bundleno = 352 (0x160), region = 40 }
  0x24   : > { %788 = dma.hbm_to_vmem [thread:$0]  (!%p1119_p2), %s239_s26, 512, %s241_s15, %s229_s1, %s1007_s2, %s1007_s2, %s1008_s23  }
  0x25   : > { %s1145_s7 = sand.u32 (!%p1106_p12), 1, %s987_s19  }
  0x26   : > { %s722_s25 = sshll.u32 (!%p1106_p12), %s1145_s7, 5  ;;  %s255_s28 = scalar_lea.sflag (!%p1106_p12), [#allocation4], %s1145_s7 }
  0x27   : > { %s258_s8 = scalar_lea.vmem (!%p1106_p12), [#allocation3], %s722_s25 }
  0x28   : > { %966 = dma.done.wait (%p1089_p7), %s255_s28, 512  }
  0x29   : > { %968 = vsyncadd (%p1089_p7), %s255_s28, 4294966784 }
  0x2a   : > { %970 = dma.done.wait (%p1079_p3), [#allocation6], 64  }
  0x2b   : > { %972 = vsyncadd (%p1079_p3), [#allocation6], 4294967232 }
  0x2c   : > { %974 = dma.done.wait (%p1079_p3), [#allocation9], 16  }
  0x2d   : > { %976 = vsyncadd (%p1079_p3), [#allocation9], 4294967280 }
  0x2e   : > { %274 = sfence }
  0x2f   : > { %v339_v0 = vld [vmem:[%s1236_s3] sm:$0xff]  ;;  %s313_s23 = sld [smem:[#allocation7]]  ;;  %v314_v1 = vld [vmem:[%s258_s8] sm:$0xff]  ;;  %v728_v4 = vld [vmem:[%s258_s8 + $0x10] sm:$0xff]  ;;  %vm340_vm0 = vcmask 64512   ;;  %vm364_vm1 = vcmask 130048  }
  0x30   : > { %359 = vmatpush.msra.mxu2 %v339_v0  ;;  %s725_s26 = sld [smem:[#allocation7 + $0x1]]  ;;  %408 = vmatpush.msra.mxu1 %v339_v0  ;;  %v726_v2 = vld [vmem:[%s258_s8 + $0x8] sm:$0xff]  ;;  %v730_v7 = vld [vmem:[%s258_s8 + $0x18] sm:$0xff]  ;;  %v465_v50 = vld [vmem:[%s1237_s4 + $0x8] sm:$0xff] }
  0x31   : > { %s727_s29 = sld [smem:[#allocation7 + $0x2]]  ;;  %v464_v46 = vld [vmem:[%s1237_s4] sm:$0xff] }
  0x32   : > { %457 = vmatpush.msrb.mxu2 %v339_v0  ;;  %s729_s10 = sld [smem:[#allocation7 + $0x3]] }
  0x33   : > { %s1164_s14 = sld [smem:[#allocation8]] }
  0x34   : > { %s741_s24 = sld [smem:[#allocation7 + $0x100]] }
  0x35   : > { %v315_v3 = vstv %s313_s23  ;;  %s742_s27 = sld [smem:[#allocation7 + $0x101]] }
  0x36   : > { %v316_v5 = vmul.f32 %v315_v3, %v314_v1  ;;  %v321_v6 = vstv %s725_s26  ;;  %s744_s11 = sld [smem:[#allocation7 + $0x102]] }
  0x37   : > { %v322_v8 = vmul.f32 %v726_v2, %v321_v6  ;;  %v327_v9 = vstv %s727_s29  ;;  %s746_s12 = sld [smem:[#allocation7 + $0x103]]  ;;  %s764_s29 = smul.u32 48, %s1145_s7 }
  0x38   : > { %v328_v10 = vmul.f32 %v728_v4, %v327_v9  ;;  %v333_v11 = vstv %s729_s10  ;;  %s1166_s9 = sld [smem:[#allocation8 + $0x2]]  ;;  %s765_s10 = smul.u32 48, %s995_s21 }
  0x39   : > { %v323_v12 = vadd.f32 %v322_v8, %v316_v5  ;;  %v334_v13 = vmul.f32 %v730_v7, %v333_v11  ;;  %s732_s15 = sld [smem:[#allocation7 + $0x80]]  ;;  %v337_v18 = vstv %s1164_s14  ;;  %s301_s14 = scalar_lea.vmem [#allocation10], %s764_s29 }
  0x3a   : > { %v417_v14 = vstv %s741_s24  ;;  %s733_s13 = sld [smem:[#allocation7 + $0x81]]  ;;  %s573_s21 = scalar_lea.sflag [#allocation5], %s1145_s7 }
  0x3b   : > { %v329_v15 = vadd.f32 %v328_v10, %v323_v12  ;;  %v418_v16 = vmul.f32 %v417_v14, %v314_v1  ;;  %v422_v17 = vstv %s742_s27  ;;  %s735_s25 = sld [smem:[#allocation7 + $0x82]] }
  0x3c   : > { %v423_v19 = vmul.f32 %v726_v2, %v422_v17  ;;  %v427_v20 = vstv %s744_s11  ;;  %s737_s28 = sld [smem:[#allocation7 + $0x83]]  ;;  %s586_s11 = scalar_lea.hbm %s1238_s5, %s765_s10 }
  0x3d   : > { %v335_v21 = vadd.f32 %v334_v13, %v329_v15  ;;  %v428_v22 = vmul.f32 %v728_v4, %v427_v20  ;;  %v432_v23 = vstv %s746_s12  ;;  %s739_s8 = sld [smem:[#allocation8 + $0x1]]  ;;  %s587_s12 = sshll.u32 %s301_s14, 4  ;;  %s588_s12 = int_to_ptr.vmem [resolvable:$true] %s587_s12 }
  0x3e   : > { %v424_v24 = vadd.f32 %v423_v19, %v418_v16  ;;  %v433_v25 = vmul.f32 %v730_v7, %v432_v23  ;;  %v436_v34 = vstv %s1166_s9  ;;  %s589_s9 = sshll.u32 %s586_s11, 4  ;;  %s590_s9 = int_to_ptr.hbm [resolvable:$true] %s589_s9 }
  0x3f   : > { %v338_v26 = vadd.f32 %v337_v18, %v335_v21  ;;  %v368_v27 = vstv %s732_s15  ;;  %s927_s15 = sshra.s32 %s590_s9, 4  ;;  %s928_s15 = int_to_ptr.hbm [resolvable:$true] %s927_s15 }
  0x40   : > { %v429_v28 = vadd.f32 %v428_v22, %v424_v24  ;;  %v369_v29 = vmul.f32 %v368_v27, %v314_v1  ;;  %v373_v30 = vstv %s733_s13  ;;  %s929_s13 = scalar_lea.hbm %s928_s15, 48  ;;  %p934_p11 = scmp.lt.s32.totalorder %s928_s15, %s1238_s5 }
  0x41   : > { %731 = vmatmul.msk.f32.vlgmr.msra.gmra.mxu2 %vm340_vm0, %v338_v26  ;;  %v374_v31 = vmul.f32 %v726_v2, %v373_v30  ;;  %v378_v32 = vstv %s735_s25  ;;  %p930_p3 = scmp.ne.s32.totalorder %s928_s15, %s929_s13 }
  0x42   : > { %v434_v33 = vadd.f32 %v433_v25, %v429_v28  ;;  %v379_v35 = vmul.f32 %v728_v4, %v378_v32  ;;  %v383_v36 = vstv %s737_s28 }
  0x43   : > { %v375_v37 = vadd.f32 %v374_v31, %v369_v29  ;;  %v384_v38 = vmul.f32 %v730_v7, %v383_v36  ;;  %v387_v41 = vstv %s739_s8  ;;  %p931_p7 = pnand %p930_p3, %p1093_p8  ;;  %s933_s8 = scalar_lea.hbm %s1238_s5, 96 }
  0x44   : > { %v437_v39 = vadd.f32 %v436_v34, %v434_v33  ;;  %p935_p12 = scmp.lt.s32.totalorder %s933_s8, %s929_s13 }
  0x45   : > { %v380_v40 = vadd.f32 %v379_v35, %v375_v37  ;;  %p932_p10 = pneg %p931_p7 }
  0x46   : > { %p936_p0 = por %p935_p12, %p934_p11 }
  0x47   : > { %v385_v42 = vadd.f32 %v384_v38, %v380_v40 }
  0x48   : > { %p937_p1 = pnand %p936_p0, %p932_p10 }
  0x49   : > { %749 = vmatmul.msk.f32.vlgmr.msrb.gmra.mxu2 %vm340_vm0, %v437_v39  ;;  %v388_v43 = vadd.f32 %v387_v41, %v385_v42 }
  0x4b   : > { %740 = vmatmul.msk.f32.vlgmr.msra.gmra.mxu1 %vm340_vm0, %v388_v43 }
  0xc4   : > { %v361_v44 = vpop.f32.mrf.mxu2 }
  0xc5   : > { %365 = vst.msk [vmem:[#allocation2] sm:$0xff] %vm364_vm1, %v361_v44 }
  0xc8   : > { %v410_v45 = vpop.f32.mrf.mxu1 }
  0xc9   : > { %414 = vst.msk [vmem:[#allocation2 + $0x8] sm:$0xff] %vm364_vm1, %v410_v45 }
  0xcc   : > { %v459_v47 = vpop.f32.mrf.mxu2  ;;  %v466_v48 = vld [vmem:[#allocation2] sm:$0xff] }
  0xcd   : > { %463 = vst.msk [vmem:[#allocation2 + $0x10] sm:$0xff] %vm364_vm1, %v459_v47  ;;  %489 = vmatpush.msra.mxu3 %v466_v48 }
  0xce   : > { %750 = vmatmul.msk.f32.vlgmr.msra.gmra.mxu3 %vm340_vm0, %v464_v46 }
  0xd0   : > { %v503_v49 = vld [vmem:[#allocation2 + $0x8] sm:$0xff] }
  0xd1   : > { %525 = vmatpush.msra.mxu0 %v503_v49 }
  0xd2   : > { %752 = vmatmul.msk.f32.vlgmr.msra.gmra.mxu0 %vm340_vm0, %v464_v46 }
  0xd4   : > { %v539_v51 = vld [vmem:[#allocation2 + $0x10] sm:$0xff] }
  0xd5   : > { %561 = vmatpush.msrb.mxu1 %v539_v51 }
  0xd6   : > { %756 = vmatmul.msk.f32.vlgmr.msrb.gmra.mxu1 %vm340_vm0, %v464_v46  ;;  %751 = vmatmul.msk.f32.gmra.mxu3 %vm340_vm0, %v465_v50 }
  0xda   : > { %753 = vmatmul.msk.f32.gmra.mxu0 %vm340_vm0, %v465_v50 }
  0xde   : > { %757 = vmatmul.msk.f32.gmra.mxu1 %vm340_vm0, %v465_v50 }
 0x14f   : > { %v527_v52 = vpop.f32.mrf.mxu0 }
 0x150   : > { %754 = vst.msk [vmem:[%s301_s14 + $0x10] sm:$0xff] %vm364_vm1, %v527_v52 }
 0x151   : > { %v491_v53 = vpop.f32.mrf.mxu3 }
 0x152   : > { %498 = vst.msk [vmem:[%s301_s14] sm:$0xff] %vm364_vm1, %v491_v53 }
 0x153   : > { %v563_v54 = vpop.f32.mrf.mxu1 }
 0x154   : > { %758 = vst.msk [vmem:[%s301_s14 + $0x20] sm:$0xff] %vm364_vm1, %v563_v54 }
 0x157   : > { %v530_v55 = vpop.f32.mrf.mxu0 }
 0x158   : > { %755 = vst.msk [vmem:[%s301_s14 + $0x18] sm:$0xff] %vm364_vm1, %v530_v55 }
 0x159   : > { %v494_v56 = vpop.f32.mrf.mxu3 }
 0x15a   : > { %499 = vst.msk [vmem:[%s301_s14 + $0x8] sm:$0xff] %vm364_vm1, %v494_v56 }
 0x15b   : > { %v566_v57 = vpop.f32.mrf.mxu1 }
 0x15c   : > { %759 = vst.msk [vmem:[%s301_s14 + $0x28] sm:$0xff] %vm364_vm1, %v566_v57 }
 0x15d   : > { %940 = shalt.err (!%p937_p1)
}
 0x15e   : > { %s1009_s7 = smov 128   ;;  %s1010_s23 = smov 8  }
 0x15f   : > { %776 = dma.vmem_to_hbm [thread:$0]  (%p1093_p8), %s588_s12, 768, %s590_s9, %s573_s21, %s1009_s7, %s1009_s7, %s1010_s23  }
 0x160 PF: > { %s1254_s26 = sld [smem:[#allocation15_spill]]  ;;  %s604_s29 = sand.u32 1, %s983_s18  }
 0x161   : > { %p790_p2 = pnand %p717_p13, %p1097_p9  ;;  %s605_s10 = scalar_lea.sflag [#allocation5], %s604_s29 }
 0x163   : > { %p791_p4 = pneg %p790_p2 }
 0x165   : > { %978 = dma.done.wait (%p791_p4), %s605_s10, 768  }
 0x166   : > { %980 = vsyncadd (%p791_p4), %s605_s10, 4294966528  ;;  %s23_s23 = sadd.s32 1, %s1254_s26   ;;  %s1255_s18 = smov %s987_s19 }
 0x167   : > { %p20_p6 = scmp.ge.s32.totalorder %s23_s23, 4   ;;  %s1256_s19 = smov %s991_s20 }
 0x168   : > { %s1257_s20 = smov %s1138_s16  ;;  %s1258_s21 = smov %s999_s22 }
 0x169   : > { %s1259_s22 = smov %s1261_s17  ;;  %22 = sbr.rel (!%p20_p6) target bundleno = 11 (0xb), region = 110 }
 0x16e   :  { %611 = vsyncpa [#allocation4], 1 }
 0x16f   :  { %613 = vsyncpa [#allocation4 + $0x1], 1 }
 0x170   :  { %614 = vsyncpa [#allocation5], 1 }
 0x171   :  { %616 = vsyncpa [#allocation5 + $0x1], 1 }
 0x172   :  { %617 = vsyncpa [#allocation6], 1 }
 0x173   :  { %619 = vsyncpa [#allocation6 + $0x1], 1 }
 0x174   :  { %620 = vsyncpa [#allocation9], 1 }

</bundles_post_ra>
